<compile_context>
chip_gen: v7x
topology: tpu7x:2x2x1
jax: 0.10.0
libtpu: 0.0.40
codegen_flags: <defaults>
</compile_context>

<pallas_src>
import jax
import jax.numpy as jnp
from jax import lax
from jax.experimental import pallas as pl
from jax.experimental.pallas import tpu as pltpu


def _make_convblock_kernel(H, W, Cin, Cout, NB):
    M1 = H * W  # spatial positions per image (lane dim)

    def kernel(x_ref, w_ref, scale_ref, shift_ref, o_ref, patch_ref):
        # x_ref:     (NB, Cin, H*W)   f32   NCHW activation, spatial flattened on lanes
        # w_ref:     (Cout, 9*Cin)    bf16  un-scaled conv weights, tap-major K
        # scale_ref: (Cout, 1)        f32   BN scale  gamma / sqrt(var + eps)
        # shift_ref: (Cout, 1)        f32   BN shift  beta + scale * (bias - mean)
        # o_ref:     (NB, Cout, H*W)  f32
        # patch_ref: (9*Cin, NB*H*W)  bf16  VMEM scratch: transposed im2col slab

        # Column-validity masks (hoisted once): emulate zero padding in the w direction.
        pos = lax.broadcasted_iota(jnp.int32, (1, M1), 1)
        col = pos % W
        not_left = col >= 1           # tap reads x[.., w-1] -> invalid at w == 0
        not_right = col <= W - 2      # tap reads x[.., w+1] -> invalid at w == W-1

        for b in range(NB):
            ximg = x_ref[b].astype(jnp.bfloat16)            # (Cin, H*W), cast in VMEM
            for t in range(9):                              # unrolled at trace time
                dy, dx = t // 3, t % 3
                d = (dy - 1) * W + (dx - 1)                 # static lane shift
                if d == 0:
                    shifted = ximg
                elif d > 0:
                    shifted = jnp.concatenate(
                        [ximg[:, d:], jnp.zeros((Cin, d), jnp.bfloat16)], axis=1)
                else:
                    shifted = jnp.concatenate(
                        [jnp.zeros((Cin, -d), jnp.bfloat16), ximg[:, :d]], axis=1)
                # h-direction zero padding is already covered by the zero fill of the
                # lane shift; only the w wrap-around at row edges needs masking.
                if dx == 0:
                    shifted = jnp.where(not_left, shifted, 0).astype(jnp.bfloat16)
                elif dx == 2:
                    shifted = jnp.where(not_right, shifted, 0).astype(jnp.bfloat16)
                patch_ref[t * Cin:(t + 1) * Cin, b * M1:(b + 1) * M1] = shifted

        # Single tap-concatenated GEMM on the MXU: (Cout, 9*Cin) @ (9*Cin, NB*H*W).
        acc = jnp.dot(w_ref[...], patch_ref[...],
                      preferred_element_type=jnp.float32)
        y = jnp.maximum(acc * scale_ref[...] + shift_ref[...], 0.0)   # f32 BN + ReLU
        for b in range(NB):                                           # lane-dense stores
            o_ref[b] = y[:, b * M1:(b + 1) * M1].astype(o_ref.dtype)

    return kernel


def _images_per_step(N, cap=8):
    """Largest divisor of N that is <= cap while keeping >= 2 grid steps when N > 1."""
    limit = min(cap, max(1, N // 2)) if N > 1 else 1
    nb = 1
    for c in range(1, limit + 1):
        if N % c == 0:
            nb = c
    return nb


def conv_block_forward(x_nchw, w_hwio, conv_bias, gamma, beta,
                       running_mean, running_var, eps=1e-5):
    """ConvBlock forward (eval-mode BN). x_nchw: (N, Cin, H, W) f32 -> (N, Cout, H, W)."""
    N, Cin, H, W = x_nchw.shape
    KH, KW, _, Cout = w_hwio.shape
    assert (KH, KW) == (3, 3)
    M1 = H * W

    # --- fold BN (eval) + conv bias into f32 per-channel scale & shift --------
    scale = gamma / jnp.sqrt(running_var + eps)                  # (Cout,)
    shift = beta + scale * (conv_bias - running_mean)            # (Cout,)
    scale_c = scale.reshape(Cout, 1).astype(jnp.float32)
    shift_c = shift.reshape(Cout, 1).astype(jnp.float32)

    # --- weights: (3,3,Cin,Cout) -> (Cout, 9*Cin), tap-major K, un-scaled bf16 -
    w_mat = jnp.transpose(w_hwio, (3, 0, 1, 2)).reshape(Cout, 9 * Cin)
    w_mat = w_mat.astype(jnp.bfloat16)

    # --- input/output stay in NCHW; only free reshapes on the wrapper side ----
    x_flat = x_nchw.reshape(N, Cin, M1)

    NB = _images_per_step(N)
    grid = (N // NB,)
    kernel = _make_convblock_kernel(H, W, Cin, Cout, NB)

    # explicit VMEM budget: double-buffered in/out blocks + scratch + headroom
    in_blk = NB * Cin * M1 * 4
    out_blk = NB * Cout * M1 * 4
    scratch_b = 9 * Cin * NB * M1 * 2
    vmem_limit = int(min(max(4 * (in_blk + out_blk) + scratch_b + (4 << 20),
                             16 << 20), 64 << 20))

    out_flat = pl.pallas_call(
        kernel,
        out_shape=jax.ShapeDtypeStruct((N, Cout, M1), jnp.float32),
        grid_spec=pltpu.PrefetchScalarGridSpec(
            num_scalar_prefetch=0,
            grid=grid,
            in_specs=[
                pl.BlockSpec((NB, Cin, M1), lambda i: (i, 0, 0)),
                pl.BlockSpec((Cout, 9 * Cin), lambda i: (0, 0)),
                pl.BlockSpec((Cout, 1), lambda i: (0, 0)),
                pl.BlockSpec((Cout, 1), lambda i: (0, 0)),
            ],
            out_specs=pl.BlockSpec((NB, Cout, M1), lambda i: (i, 0, 0)),
            scratch_shapes=[pltpu.VMEM((9 * Cin, NB * M1), jnp.bfloat16)],
        ),
        compiler_params=pltpu.CompilerParams(
            dimension_semantics=("parallel",),
            vmem_limit_bytes=vmem_limit),
    )(x_flat, w_mat, scale_c, shift_c)

    return out_flat.reshape(N, Cout, H, W)   # free reshape: already NCHW order


def _reference(x_nchw, w_hwio, conv_bias, gamma, beta, rmean, rvar, eps=1e-5):
    # pure-JAX f32 reference (lax conv, NCHW semantics like PyTorch)
    w_oihw = jnp.transpose(w_hwio, (3, 2, 0, 1))            # (Cout,Cin,3,3)
    y = lax.conv_general_dilated(
        x_nchw, w_oihw, window_strides=(1, 1), padding=((1, 1), (1, 1)),
        dimension_numbers=("NCHW", "OIHW", "NCHW"))
    y = y + conv_bias[None, :, None, None]
    y = (y - rmean[None, :, None, None]) / jnp.sqrt(rvar[None, :, None, None] + eps)
    y = y * gamma[None, :, None, None] + beta[None, :, None, None]
    return jnp.maximum(y, 0.0)


if __name__ == "__main__":
    key = jax.random.PRNGKey(0)
    N, Cin, Cout, H, W = 2, 4, 8, 16, 16

    k1, k2, k3, k4, k5, k6 = jax.random.split(key, 6)
    x = jax.random.normal(k1, (N, Cin, H, W), dtype=jnp.float32)
    # deterministic parameter init (shapes per nn.Conv2d / nn.BatchNorm2d)
    w_hwio = jax.random.normal(k2, (3, 3, Cin, Cout), dtype=jnp.float32) * 0.1
    conv_bias = jax.random.normal(k3, (Cout,), dtype=jnp.float32) * 0.1
    gamma = 1.0 + 0.1 * jax.random.normal(k4, (Cout,), dtype=jnp.float32)
    beta = 0.1 * jax.random.normal(k5, (Cout,), dtype=jnp.float32)
    running_mean = 0.1 * jax.random.normal(k6, (Cout,), dtype=jnp.float32)
    running_var = jnp.ones((Cout,), dtype=jnp.float32)

    out = conv_block_forward(x, w_hwio, conv_bias, gamma, beta,
                             running_mean, running_var)
    out = jax.block_until_ready(out)

    ref = _reference(x, w_hwio, conv_bias, gamma, beta, running_mean, running_var)
    assert out.shape == (N, Cout, H, W)
    # relaxed tolerance: MXU operands are bf16 (f32 accumulation, f32 BN epilogue)
    assert jnp.allclose(out, ref, atol=3e-2, rtol=3e-2)
    print("KERNEL_OK")
</pallas_src>

<mosaic_0001>
module attributes {stable_mosaic.version = 11 : i64} {
  func.func @kernel(%arg0: i32, %arg1: memref<1x4x256xf32, #tpu.memory_space<vmem>>, %arg2: memref<8x36xbf16, #tpu.memory_space<vmem>>, %arg3: memref<8x1xf32, #tpu.memory_space<vmem>>, %arg4: memref<8x1xf32, #tpu.memory_space<vmem>>, %arg5: memref<1x8x256xf32, #tpu.memory_space<vmem>>, %arg6: memref<36x256xbf16, #tpu.memory_space<vmem>>) attributes {dimension_semantics = [#tpu.dimension_semantics<parallel>], iteration_bounds = array<i64: 2>, scalar_prefetch = 0 : i64, scratch_operands = 1 : i64, tpu.core_type = #tpu.core_type<tc>, window_params = [{transform_indices = @transform_0, window_bounds = array<i64: 1, 4, 256>}, {pipeline_mode = #tpu.pipeline_mode<synchronous>, transform_indices = @transform_1, window_bounds = array<i64: 8, 36>}, {pipeline_mode = #tpu.pipeline_mode<synchronous>, transform_indices = @transform_2, window_bounds = array<i64: 8, 1>}, {pipeline_mode = #tpu.pipeline_mode<synchronous>, transform_indices = @transform_3, window_bounds = array<i64: 8, 1>}, {transform_indices = @transform_4, window_bounds = array<i64: 1, 8, 256>}]} {
    %0 = tpu.iota {dimensions = array<i32: 1>} : vector<1x256xi32>
    %c16_i32 = arith.constant 16 : i32
    %c0_i32 = arith.constant 0 : i32
    %1 = arith.cmpi eq, %c16_i32, %c0_i32 : i32
    %c1_i32 = arith.constant 1 : i32
    %2 = arith.select %1, %c1_i32, %c16_i32 : i32
    %3 = vector.broadcast %2 : i32 to vector<1x256xi32>
    %4 = arith.remsi %0, %3 : vector<1x256xi32>
    %c0_i32_0 = arith.constant 0 : i32
    %5 = vector.broadcast %c0_i32_0 : i32 to vector<1x256xi32>
    %6 = arith.cmpi ne, %4, %5 : vector<1x256xi32>
    %c0_i32_1 = arith.constant 0 : i32
    %7 = vector.broadcast %c0_i32_1 : i32 to vector<1x256xi32>
    %8 = arith.cmpi slt, %4, %7 : vector<1x256xi32>
    %c0_i32_2 = arith.constant 0 : i32
    %9 = arith.cmpi slt, %2, %c0_i32_2 : i32
    %10 = vector.broadcast %9 : i1 to vector<1x256xi1>
    %11 = vector.broadcast %10 : vector<1x256xi1> to vector<1x256xi1>
    %12 = arith.xori %8, %11 : vector<1x256xi1>
    %13 = arith.andi %12, %6 : vector<1x256xi1>
    %14 = vector.broadcast %2 : i32 to vector<1x256xi32>
    %15 = arith.addi %4, %14 : vector<1x256xi32>
    %16 = arith.select %13, %15, %4 : vector<1x256xi1>, vector<1x256xi32>
    %c1_i32_3 = arith.constant 1 : i32
    %17 = vector.broadcast %c1_i32_3 : i32 to vector<1x256xi32>
    %18 = arith.cmpi sge, %16, %17 : vector<1x256xi32>
    %c14_i32 = arith.constant 14 : i32
    %19 = vector.broadcast %c14_i32 : i32 to vector<1x256xi32>
    %20 = arith.cmpi sle, %16, %19 : vector<1x256xi32>
    %c0 = arith.constant 0 : index
    %c0_4 = arith.constant 0 : index
    %c0_5 = arith.constant 0 : index
    %21 = vector.load %arg1[%c0, %c0_4, %c0_5] : memref<1x4x256xf32, #tpu.memory_space<vmem>>, vector<1x4x256xf32>
    %22 = vector.shape_cast %21 : vector<1x4x256xf32> to vector<4x256xf32>
    %23 = arith.truncf %22 : vector<4x256xf32> to vector<4x256xbf16>
    %cst = arith.constant 0.000000e+00 : bf16
    %24 = vector.broadcast %cst : bf16 to vector<4x17xbf16>
    %25 = vector.extract_strided_slice %23 {offsets = [0, 0], sizes = [4, 239], strides = [1, 1]} : vector<4x256xbf16> to vector<4x239xbf16>
    %26 = tpu.concatenate %24, %25 in 1 : vector<4x17xbf16>, vector<4x239xbf16> -> vector<4x256xbf16>
    %c0_i32_6 = arith.constant 0 : i32
    %27 = arith.sitofp %c0_i32_6 : i32 to bf16
    %28 = vector.shape_cast %18 : vector<1x256xi1> to vector<1x256xi1>
    %29 = vector.broadcast %28 : vector<1x256xi1> to vector<4x256xi1>
    %30 = vector.broadcast %27 : bf16 to vector<4x256xbf16>
    %31 = arith.select %29, %26, %30 : vector<4x256xi1>, vector<4x256xbf16>
    %c0_7 = arith.constant 0 : index
    %c0_8 = arith.constant 0 : index
    %32 = vector.load %arg6[%c0_7, %c0_8] : memref<36x256xbf16, #tpu.memory_space<vmem>>, vector<4x256xbf16>
    tpu.vector_store %arg6[%c0_7, %c0_8], %31 {strides = array<i32>} : memref<36x256xbf16, #tpu.memory_space<vmem>>, vector<4x256xbf16>,
    %cst_9 = arith.constant 0.000000e+00 : bf16
    %33 = vector.broadcast %cst_9 : bf16 to vector<4x16xbf16>
    %34 = vector.extract_strided_slice %23 {offsets = [0, 0], sizes = [4, 240], strides = [1, 1]} : vector<4x256xbf16> to vector<4x240xbf16>
    %35 = tpu.concatenate %33, %34 in 1 : vector<4x16xbf16>, vector<4x240xbf16> -> vector<4x256xbf16>
    %c4 = arith.constant 4 : index
    %c0_10 = arith.constant 0 : index
    %36 = vector.load %arg6[%c4, %c0_10] : memref<36x256xbf16, #tpu.memory_space<vmem>>, vector<4x256xbf16>
    tpu.vector_store %arg6[%c4, %c0_10], %35 {strides = array<i32>} : memref<36x256xbf16, #tpu.memory_space<vmem>>, vector<4x256xbf16>,
    %cst_11 = arith.constant 0.000000e+00 : bf16
    %37 = vector.broadcast %cst_11 : bf16 to vector<4x15xbf16>
    %38 = vector.extract_strided_slice %23 {offsets = [0, 0], sizes = [4, 241], strides = [1, 1]} : vector<4x256xbf16> to vector<4x241xbf16>
    %39 = tpu.concatenate %37, %38 in 1 : vector<4x15xbf16>, vector<4x241xbf16> -> vector<4x256xbf16>
    %c0_i32_12 = arith.constant 0 : i32
    %40 = arith.sitofp %c0_i32_12 : i32 to bf16
    %41 = vector.shape_cast %20 : vector<1x256xi1> to vector<1x256xi1>
    %42 = vector.broadcast %41 : vector<1x256xi1> to vector<4x256xi1>
    %43 = vector.broadcast %40 : bf16 to vector<4x256xbf16>
    %44 = arith.select %42, %39, %43 : vector<4x256xi1>, vector<4x256xbf16>
    %c8 = arith.constant 8 : index
    %c0_13 = arith.constant 0 : index
    %45 = vector.load %arg6[%c8, %c0_13] : memref<36x256xbf16, #tpu.memory_space<vmem>>, vector<4x256xbf16>
    tpu.vector_store %arg6[%c8, %c0_13], %44 {strides = array<i32>} : memref<36x256xbf16, #tpu.memory_space<vmem>>, vector<4x256xbf16>,
    %cst_14 = arith.constant 0.000000e+00 : bf16
    %46 = vector.broadcast %cst_14 : bf16 to vector<4x1xbf16>
    %47 = vector.extract_strided_slice %23 {offsets = [0, 0], sizes = [4, 255], strides = [1, 1]} : vector<4x256xbf16> to vector<4x255xbf16>
    %48 = tpu.concatenate %46, %47 in 1 : vector<4x1xbf16>, vector<4x255xbf16> -> vector<4x256xbf16>
    %c0_i32_15 = arith.constant 0 : i32
    %49 = arith.sitofp %c0_i32_15 : i32 to bf16
    %50 = vector.shape_cast %18 : vector<1x256xi1> to vector<1x256xi1>
    %51 = vector.broadcast %50 : vector<1x256xi1> to vector<4x256xi1>
    %52 = vector.broadcast %49 : bf16 to vector<4x256xbf16>
    %53 = arith.select %51, %48, %52 : vector<4x256xi1>, vector<4x256xbf16>
    %c12 = arith.constant 12 : index
    %c0_16 = arith.constant 0 : index
    %54 = vector.load %arg6[%c12, %c0_16] : memref<36x256xbf16, #tpu.memory_space<vmem>>, vector<4x256xbf16>
    tpu.vector_store %arg6[%c12, %c0_16], %53 {strides = array<i32>} : memref<36x256xbf16, #tpu.memory_space<vmem>>, vector<4x256xbf16>,
    %c16 = arith.constant 16 : index
    %c0_17 = arith.constant 0 : index
    %55 = vector.load %arg6[%c16, %c0_17] : memref<36x256xbf16, #tpu.memory_space<vmem>>, vector<4x256xbf16>
    tpu.vector_store %arg6[%c16, %c0_17], %23 {strides = array<i32>} : memref<36x256xbf16, #tpu.memory_space<vmem>>, vector<4x256xbf16>,
    %56 = vector.extract_strided_slice %23 {offsets = [0, 1], sizes = [4, 255], strides = [1, 1]} : vector<4x256xbf16> to vector<4x255xbf16>
    %cst_18 = arith.constant 0.000000e+00 : bf16
    %57 = vector.broadcast %cst_18 : bf16 to vector<4x1xbf16>
    %58 = tpu.concatenate %56, %57 in 1 : vector<4x255xbf16>, vector<4x1xbf16> -> vector<4x256xbf16>
    %c0_i32_19 = arith.constant 0 : i32
    %59 = arith.sitofp %c0_i32_19 : i32 to bf16
    %60 = vector.shape_cast %20 : vector<1x256xi1> to vector<1x256xi1>
    %61 = vector.broadcast %60 : vector<1x256xi1> to vector<4x256xi1>
    %62 = vector.broadcast %59 : bf16 to vector<4x256xbf16>
    %63 = arith.select %61, %58, %62 : vector<4x256xi1>, vector<4x256xbf16>
    %c20 = arith.constant 20 : index
    %c0_20 = arith.constant 0 : index
    %64 = vector.load %arg6[%c20, %c0_20] : memref<36x256xbf16, #tpu.memory_space<vmem>>, vector<4x256xbf16>
    tpu.vector_store %arg6[%c20, %c0_20], %63 {strides = array<i32>} : memref<36x256xbf16, #tpu.memory_space<vmem>>, vector<4x256xbf16>,
    %65 = vector.extract_strided_slice %23 {offsets = [0, 15], sizes = [4, 241], strides = [1, 1]} : vector<4x256xbf16> to vector<4x241xbf16>
    %cst_21 = arith.constant 0.000000e+00 : bf16
    %66 = vector.broadcast %cst_21 : bf16 to vector<4x15xbf16>
    %67 = tpu.concatenate %65, %66 in 1 : vector<4x241xbf16>, vector<4x15xbf16> -> vector<4x256xbf16>
    %c0_i32_22 = arith.constant 0 : i32
    %68 = arith.sitofp %c0_i32_22 : i32 to bf16
    %69 = vector.shape_cast %18 : vector<1x256xi1> to vector<1x256xi1>
    %70 = vector.broadcast %69 : vector<1x256xi1> to vector<4x256xi1>
    %71 = vector.broadcast %68 : bf16 to vector<4x256xbf16>
    %72 = arith.select %70, %67, %71 : vector<4x256xi1>, vector<4x256xbf16>
    %c24 = arith.constant 24 : index
    %c0_23 = arith.constant 0 : index
    %73 = vector.load %arg6[%c24, %c0_23] : memref<36x256xbf16, #tpu.memory_space<vmem>>, vector<4x256xbf16>
    tpu.vector_store %arg6[%c24, %c0_23], %72 {strides = array<i32>} : memref<36x256xbf16, #tpu.memory_space<vmem>>, vector<4x256xbf16>,
    %74 = vector.extract_strided_slice %23 {offsets = [0, 16], sizes = [4, 240], strides = [1, 1]} : vector<4x256xbf16> to vector<4x240xbf16>
    %cst_24 = arith.constant 0.000000e+00 : bf16
    %75 = vector.broadcast %cst_24 : bf16 to vector<4x16xbf16>
    %76 = tpu.concatenate %74, %75 in 1 : vector<4x240xbf16>, vector<4x16xbf16> -> vector<4x256xbf16>
    %c28 = arith.constant 28 : index
    %c0_25 = arith.constant 0 : index
    %77 = vector.load %arg6[%c28, %c0_25] : memref<36x256xbf16, #tpu.memory_space<vmem>>, vector<4x256xbf16>
    tpu.vector_store %arg6[%c28, %c0_25], %76 {strides = array<i32>} : memref<36x256xbf16, #tpu.memory_space<vmem>>, vector<4x256xbf16>,
    %78 = vector.extract_strided_slice %23 {offsets = [0, 17], sizes = [4, 239], strides = [1, 1]} : vector<4x256xbf16> to vector<4x239xbf16>
    %cst_26 = arith.constant 0.000000e+00 : bf16
    %79 = vector.broadcast %cst_26 : bf16 to vector<4x17xbf16>
    %80 = tpu.concatenate %78, %79 in 1 : vector<4x239xbf16>, vector<4x17xbf16> -> vector<4x256xbf16>
    %c0_i32_27 = arith.constant 0 : i32
    %81 = arith.sitofp %c0_i32_27 : i32 to bf16
    %82 = vector.shape_cast %20 : vector<1x256xi1> to vector<1x256xi1>
    %83 = vector.broadcast %82 : vector<1x256xi1> to vector<4x256xi1>
    %84 = vector.broadcast %81 : bf16 to vector<4x256xbf16>
    %85 = arith.select %83, %80, %84 : vector<4x256xi1>, vector<4x256xbf16>
    %c32 = arith.constant 32 : index
    %c0_28 = arith.constant 0 : index
    %86 = vector.load %arg6[%c32, %c0_28] : memref<36x256xbf16, #tpu.memory_space<vmem>>, vector<4x256xbf16>
    tpu.vector_store %arg6[%c32, %c0_28], %85 {strides = array<i32>} : memref<36x256xbf16, #tpu.memory_space<vmem>>, vector<4x256xbf16>,
    %c0_29 = arith.constant 0 : index
    %c0_30 = arith.constant 0 : index
    %87 = vector.load %arg2[%c0_29, %c0_30] : memref<8x36xbf16, #tpu.memory_space<vmem>>, vector<8x36xbf16>
    %c0_31 = arith.constant 0 : index
    %c0_32 = arith.constant 0 : index
    %88 = vector.load %arg6[%c0_31, %c0_32] : memref<36x256xbf16, #tpu.memory_space<vmem>>, vector<36x256xbf16>
    %cst_33 = arith.constant dense<0.000000e+00> : vector<8x256xf32>
    %89 = tpu.matmul %87, %88, %cst_33 {dimension_numbers = #tpu.dot_dimension_numbers<[1], [0], [0], [1], [0, 0, 1, 1], [], []>} : vector<8x36xbf16>, vector<36x256xbf16>, vector<8x256xf32> -> vector<8x256xf32>
    %c0_34 = arith.constant 0 : index
    %c0_35 = arith.constant 0 : index
    %90 = vector.load %arg3[%c0_34, %c0_35] : memref<8x1xf32, #tpu.memory_space<vmem>>, vector<8x1xf32>
    %91 = vector.broadcast %90 : vector<8x1xf32> to vector<8x256xf32>
    %92 = arith.mulf %89, %91 : vector<8x256xf32>
    %c0_36 = arith.constant 0 : index
    %c0_37 = arith.constant 0 : index
    %93 = vector.load %arg4[%c0_36, %c0_37] : memref<8x1xf32, #tpu.memory_space<vmem>>, vector<8x1xf32>
    %94 = vector.broadcast %93 : vector<8x1xf32> to vector<8x256xf32>
    %95 = arith.addf %92, %94 : vector<8x256xf32>
    %cst_38 = arith.constant 0.000000e+00 : f32
    %96 = vector.broadcast %cst_38 : f32 to vector<8x256xf32>
    %97 = arith.maximumf %95, %96 : vector<8x256xf32>
    %c0_39 = arith.constant 0 : index
    %c0_40 = arith.constant 0 : index
    %c0_41 = arith.constant 0 : index
    %98 = vector.load %arg5[%c0_39, %c0_40, %c0_41] : memref<1x8x256xf32, #tpu.memory_space<vmem>>, vector<1x8x256xf32>
    %99 = vector.shape_cast %98 : vector<1x8x256xf32> to vector<8x256xf32>
    %100 = vector.shape_cast %97 : vector<8x256xf32> to vector<1x8x256xf32>
    tpu.vector_store %arg5[%c0_39, %c0_40, %c0_41], %100 {strides = array<i32>} : memref<1x8x256xf32, #tpu.memory_space<vmem>>, vector<1x8x256xf32>,
    return
  }
  func.func @transform_0(%arg0: i32) -> (i32, i32, i32) {
    %c0_i32 = arith.constant 0 : i32
    %c0_i32_0 = arith.constant 0 : i32
    %c0_i32_1 = arith.constant 0 : i32
    return %arg0, %c0_i32, %c0_i32_0 : i32, i32, i32
  }
  func.func @transform_1(%arg0: i32) -> (i32, i32) {
    %c0_i32 = arith.constant 0 : i32
    %c0_i32_0 = arith.constant 0 : i32
    %c0_i32_1 = arith.constant 0 : i32
    return %c0_i32, %c0_i32_0 : i32, i32
  }
  func.func @transform_2(%arg0: i32) -> (i32, i32) {
    %c0_i32 = arith.constant 0 : i32
    %c0_i32_0 = arith.constant 0 : i32
    %c0_i32_1 = arith.constant 0 : i32
    return %c0_i32, %c0_i32_0 : i32, i32
  }
  func.func @transform_3(%arg0: i32) -> (i32, i32) {
    %c0_i32 = arith.constant 0 : i32
    %c0_i32_0 = arith.constant 0 : i32
    %c0_i32_1 = arith.constant 0 : i32
    return %c0_i32, %c0_i32_0 : i32, i32
  }
  func.func @transform_4(%arg0: i32) -> (i32, i32, i32) {
    %c0_i32 = arith.constant 0 : i32
    %c0_i32_0 = arith.constant 0 : i32
    %c0_i32_1 = arith.constant 0 : i32
    return %arg0, %c0_i32, %c0_i32_0 : i32, i32, i32
  }
}

</mosaic_0001>

<bundles_post_ra>
// kernel: tpu_custom_call.1
= control target key start
LH: loop header
LB: loop body
LE: loop exit
PB: predicated region body
PF: predicated region fallthrough
CT: control target
= control target key end

     0   :  { %9 = vsyncpa [#allocation4], 0  ;;  %s944_s0 = inlined_call_operand.vmem [shape: f32[2,4,256], index: 0, kind: input, shape index: {}]   ;;  %s945_s1 = inlined_call_operand.vmem [shape: bf16[8,36], index: 1, kind: input, shape index: {}]   ;;  %s946_s2 = inlined_call_operand.vmem [shape: f32[8,1], index: 2, kind: input, shape index: {}]   ;;  %s947_s3 = inlined_call_operand.vmem [shape: f32[8,1], index: 3, kind: input, shape index: {}]   ;;  %s948_s4 = inlined_call_operand.hbm [shape: f32[2,8,256], index: 4, kind: output, shape index: {}]  }
   0x1   :  { %11 = vsyncpa [#allocation4 + $0x1], 0  ;;  %s797_s15 = smov 0   ;;  %s799_s16 = smov 0  }
   0x2   :  { %s801_s17 = smov 0   ;;  %s803_s18 = smov 0  }
   0x3 LB: > { %s818_s19 = sadd.s32 4294967295, %s760_s18   ;;  %s607_s20 = sadd.s32 4294967294, %s760_s18   ;;  %s760_s18 = sphi %s803_s18, %s954_s18   ;;  %s756_s17 = sphi %s801_s17, %s953_s17   ;;  %s752_s16 = sphi %s799_s16, %s952_s16   ;;  %s748_s15 = sphi %s797_s15, %s951_s15  }
   0x4   : > { %s822_s21 = sadd.s32 1, %s760_s18   ;;  %s113_s22 = sadd.s32 1, %s756_s17 }
   0x5   : > { %s110_s23 = ssub.s32 %s760_s18, %s822_s21  ;;  %p123_p0 = scmp.ne.s32.totalorder %s756_s17, %s752_s16 }
   0x6   : > { %p111_p1 = scmp.eq.s32.totalorder %s110_s23, 0  ;;  %p124_p2 = scmp.eq.s32.totalorder %s818_s19, 1 }
   0x7   : > { %p129_p3 = scmp.ne.s32.totalorder %s752_s16, %s748_s15  ;;  %p130_p4 = scmp.eq.s32.totalorder %s607_s20, 1 }
   0x8   : > { %s833_s24 = scalar_select %p111_p1, %s756_s17, %s113_s22  }
   0x9   : > { %p835_p5 = por %p124_p2, %p123_p0  ;;  %p839_p6 = por %p130_p4, %p129_p3 }
   0xa   : > { %p610_p7 = scmp.ge.s32.totalorder %s760_s18, 1  ;;  %p165_p8 = scmp.lt.s32.totalorder %s760_s18, 3 }
   0xc   : > { %p166_p9 = pnand %p610_p7, %p165_p8 }
   0xd   : > { %p191_p10 = scmp.lt.s32.totalorder (!%p166_p9), %s818_s19, 1  ;;  %v762_v0 = vmov (!%p166_p9), 0   ;;  %s763_s6 = smov (!%p166_p9), 16   ;;  %v513_v6 = vld [vmem:[%s946_s2] sm:$0xff] (!%p166_p9)  ;;  %v199_v8 = vlaneseq (!%p166_p9)  ;;  %vm279_vm6 = vcmask (!%p166_p9), 130048   ;;  %vm331_vm7 = vcmask (!%p166_p9), 7168  }
   0xe   : > { %169 = sbr.rel (%p166_p9) target bundleno = 422 (0x1a6), region = 36  ;;  %504 = vmatprep.mubr.bf16.mxu0 (!%p166_p9), %v762_v0  ;;  %687 = vset.pattern.permute.xlu0 (!%p166_p9), %v762_v0  ;;  %s764_s7 = smov (!%p166_p9), 1   ;;  %v521_v7 = vld [vmem:[%s947_s3] sm:$0xff] (!%p166_p9)  ;;  %vm242_vm8 = vcmask (!%p166_p9), 138240   ;;  %vm295_vm11 = vcmask (!%p166_p9), 121856   ;;  %vm357_vm14 = vcmask (!%p166_p9), 1039360  }
   0xf   : > { %688 = vset.pattern.permute.xlu1 (!%p166_p9), %v762_v0  ;;  %s765_s8 = smov (!%p166_p9), 17   ;;  %s766_s9 = smov (!%p166_p9), 15   ;;  %v200_v9 = vand.u32 (!%p166_p9), 127, %v199_v8  ;;  %v257_v13 = vshrl.u32 (!%p166_p9), %v199_v8, 7  ;;  %vm398_vm15 = vcmask (!%p166_p9), 916480  }
  0x10   : > { %s767_s10 = smov (!%p166_p9), 127   ;;  %s768_s11 = smov (!%p166_p9), 112  }
  0x11   : > { %s769_s12 = smov (!%p166_p9), 113   ;;  %s770_s13 = smov (!%p166_p9), 111   ;;  %v201_v10 = vadd.s32 (!%p166_p9), 128, %v200_v9  ;;  %v206_v11 = vand.u32 (!%p166_p9), 15, %v200_v9  ;;  %v258_v14 = vsub.s32 (!%p166_p9), 0, %v257_v13  ;;  %v262_v15 = vsub.s32 (!%p166_p9), 4, %v257_v13 }
  0x12   : > { %s188_s29 = sand.u32 (!%p166_p9), 1, %s752_s16  }
  0x13   : > { %v213_v12 = vand.u32 (!%p166_p9), 15, %v201_v10  ;;  %vm226_vm0 = vcmp.ge.s32.totalorder (!%p166_p9), %v206_v11, 1  ;;  %vm228_vm3 = vcmp.le.s32.totalorder (!%p166_p9), %v206_v11, 14  ;;  %s611_s30 = sshll.u32 (!%p166_p9), %s188_s29, 4 }
  0x15   : > { %s192_s27 = scalar_select %p191_p10, %s818_s19, 1  ;;  %vm227_vm1 = vcmp.ge.s32.totalorder %v213_v12, 1  ;;  %vm229_vm4 = vcmp.le.s32.totalorder %v213_v12, 14 }
  0x16   : > { %vm254_vm2 = vmpackc.low %vm227_vm1, %vm226_vm0  ;;  %vm378_vm0 = vcmask 924672   ;;  %vm414_vm1 = vcmask 908288  }
  0x17   : > { %s636_s28 = sshll.u32 %s192_s27, 3  ;;  %v255_v17 = vsel %vm254_vm2, 65537, %v762_v0  ;;  %vm306_vm5 = vmpackc.low %vm229_vm4, %vm228_vm3  ;;  %vm465_vm2 = vcmask 1041408   ;;  %vm461_vm3 = vcmask 293888  }
  0x18   : > { %s195_s5 = scalar_lea.vmem %s944_s0, %s636_s28  ;;  %v856_v19 = vrot.slane %v255_v17, %v258_v14  ;;  %v858_v20 = vrot.slane %v255_v17, %v262_v15  ;;  %v307_v21 = vsel %vm306_vm5, 65537, %v762_v0 }
  0x19   : > { %v230_v1 = vld [vmem:[%s195_s5] sm:$0xff]  ;;  %v860_v27 = vrot.slane %v307_v21, %v258_v14  ;;  %v862_v28 = vrot.slane %v307_v21, %v262_v15  ;;  %s638_s5 = sshll.u32 %s818_s19, 8  ;;  %s771_s19 = smov [#allocation3]  }
  0x1a   : > { %v234_v2 = vpack.c.bf16 %v230_v1, %v230_v1  ;;  %v232_v3 = vcombine.high %v230_v1, %v230_v1  ;;  %vm264_vm9 = vcmp.ne.s16.totalorder %v856_v19, 0  ;;  %vm265_vm10 = vcmp.ne.s16.totalorder %v858_v20, 0 }
  0x1b   : > { %vm316_vm12 = vcmp.ne.s16.totalorder %v860_v27, 0  ;;  %vm317_vm13 = vcmp.ne.s16.totalorder %v862_v28, 0 }
  0x1c   : > { %275 = vrot.lane.b32.xlu1 %v234_v2, %s763_s6  ;;  %327 = vrot.lane.b32.xlu0 %v234_v2, %s764_s7  ;;  %v235_v4 = vpack.c.bf16 %v232_v3, %v232_v3  ;;  %v637_v5 = vpack.c.bf16 %v232_v3, %v230_v1 }
  0x1e   : > { %352 = vst [vmem:[#allocation2 + $0x10] sm:$0x33] %v637_v5 }
  0x20   : > { %238 = vrot.lane.b32.xlu0 %v234_v2, %s765_s8  ;;  %277 = vrot.lane.b32.xlu1 %v235_v4, %s763_s6  ;;  %s190_s6 = scalar_lea.vmem [#allocation3], %s611_s30 }
  0x24   : > { %240 = vrot.lane.b32.xlu1 %v235_v4, %s765_s8  ;;  %329 = vrot.lane.b32.xlu0 %v235_v4, %s764_s7  ;;  %s548_s7 = sshll.u32 %s190_s6, 4  ;;  %s904_s7 = int_to_ptr.vmem [resolvable:$true] %s548_s7 }
  0x28   : > { %293 = vrot.lane.b32.xlu1 %v235_v4, %s766_s9  ;;  %291 = vrot.lane.b32.xlu0 %v234_v2, %s766_s9 }
  0x2c   : > { %355 = vrot.lane.b32.xlu1 %v235_v4, %s767_s10  ;;  %353 = vrot.lane.b32.xlu0 %v234_v2, %s767_s10  ;;  %s902_s10 = scalar_lea.hbm %s948_s4, %s638_s5 }
  0x30   : > { %396 = vrot.lane.b32.xlu1 %v235_v4, %s768_s11  ;;  %394 = vrot.lane.b32.xlu0 %v234_v2, %s768_s11  ;;  %s534_s11 = scalar_lea.sflag [#allocation4], %s188_s29 }
  0x34   : > { %376 = vrot.lane.b32.xlu1 %v235_v4, %s769_s12  ;;  %374 = vrot.lane.b32.xlu0 %v234_v2, %s769_s12  ;;  %s698_s12 = scalar_lea.vmem %s904_s7, 256 }
  0x35   : > { %p699_p11 = scmp.ne.s32.totalorder %s904_s7, %s698_s12 }
  0x37   : > { %p700_p12 = pnand %p699_p11, %p835_p5 }
  0x38   : > { %412 = vrot.lane.b32.xlu1 %v235_v4, %s770_s13  ;;  %410 = vrot.lane.b32.xlu0 %v234_v2, %s770_s13  ;;  %s702_s13 = sshll.u32 %s771_s19, 4  ;;  %s703_s13 = int_to_ptr.vmem [resolvable:$false] %s702_s13 }
  0x39   : > { %p701_p13 = pneg %p700_p12  ;;  %s704_s14 = scalar_lea.vmem %s703_s13, 512 }
  0x3a   : > { %p705_p0 = scmp.lt.s32.totalorder %s904_s7, %s703_s13  ;;  %p706_p1 = scmp.lt.s32.totalorder %s704_s14, %s698_s12 }
  0x3c   : > { %516 = vperm.xlu0 %687, %v513_v6   ;;  %524 = vperm.xlu1 %688, %v521_v7   ;;  %p707_p2 = por %p706_p1, %p705_p0 }
  0x3e   : > { %p708_p3 = pnand %p707_p2, %p701_p13 }
  0x8e   : > { %v276_v16 = vpop.permute.xlu1 %275  ;;  %v328_v18 = vpop.permute.xlu0 %327 }
  0x8f   : > { %v283_v24 = vsel %vm279_vm6, 0, %v276_v16  ;;  %v336_v29 = vsel %vm331_vm7, 0, %v328_v18 }
  0x90   : > { %v338_v36 = vsel %vm264_vm9, %v336_v29, 0 }
  0x92   : > { %v239_v22 = vpop.permute.xlu0 %238  ;;  %v278_v23 = vpop.permute.xlu1 %277 }
  0x93   : > { %v280_v25 = vsel %vm279_vm6, %v276_v16, %v278_v23  ;;  %v248_v30 = vsel %vm242_vm8, 0, %v239_v22 }
  0x94   : > { %v615_v26 = vcombine.low %v283_v24, %v280_v25  ;;  %v266_v37 = vsel %vm264_vm9, %v248_v30, 0 }
  0x96   : > { %v288_v31 = vrot.slane %v615_v26, 6  ;;  %v241_v32 = vpop.permute.xlu1 %240  ;;  %v330_v33 = vpop.permute.xlu0 %329 }
  0x97   : > { %v243_v34 = vsel %vm242_vm8, %v239_v22, %v241_v32  ;;  %v332_v35 = vsel %vm331_vm7, %v328_v18, %v330_v33  ;;  %v430_v22 = vld [vmem:[%s945_s1] sm:$0xf] }
  0x98   : > { %290 = vst [vmem:[#allocation2] sm:$0xcc] %v288_v31  ;;  %v267_v38 = vsel %vm265_vm10, %v243_v34, 0  ;;  %v339_v39 = vsel %vm265_vm10, %v332_v35, 0 }
  0x99   : > { %v614_v40 = vcombine.low %v266_v37, %v267_v38  ;;  %v617_v41 = vcombine.low %v338_v36, %v339_v39 }
  0x9a   : > { %v294_v42 = vpop.permute.xlu1 %293  ;;  %v292_v43 = vpop.permute.xlu0 %291 }
  0x9b   : > { %274 = vst [vmem:[#allocation2] sm:$0x33] %v614_v40  ;;  %v345_v44 = vrot.slane %v617_v41, 6  ;;  %v296_v45 = vsel %vm295_vm11, %v292_v43, %v294_v42  ;;  %v300_v46 = vsel %vm295_vm11, 0, %v292_v43 }
  0x9c   : > { %v318_v47 = vsel %vm316_vm12, %v300_v46, 0  ;;  %v319_v48 = vsel %vm317_vm13, %v296_v45, 0 }
  0x9d   : > { %347 = vst [vmem:[#allocation2 + $0x8] sm:$0xcc] %v345_v44  ;;  %v616_v49 = vcombine.low %v318_v47, %v319_v48 }
  0x9e   : > { %v356_v50 = vpop.permute.xlu1 %355  ;;  %v354_v51 = vpop.permute.xlu0 %353 }
  0x9f   : > { %326 = vst [vmem:[#allocation2 + $0x8] sm:$0x33] %v616_v49  ;;  %v362_v52 = vsel %vm357_vm14, %v356_v50, 0  ;;  %v358_v53 = vsel %vm357_vm14, %v354_v51, %v356_v50 }
  0xa0   : > { %v365_v54 = vsel %vm317_vm13, %v362_v52, 0  ;;  %v364_v55 = vsel %vm316_vm12, %v358_v53, 0 }
  0xa1   : > { %v619_v56 = vcombine.low %v364_v55, %v365_v54 }
  0xa2   : > { %v397_v57 = vpop.permute.xlu1 %396  ;;  %v395_v58 = vpop.permute.xlu0 %394 }
  0xa3   : > { %v371_v59 = vrot.slane %v619_v56, 6  ;;  %v402_v60 = vsel %vm398_vm15, %v397_v57, 0  ;;  %v399_v61 = vsel %vm398_vm15, %v395_v58, %v397_v57 }
  0xa4   : > { %v621_v62 = vcombine.low %v399_v61, %v402_v60 }
  0xa5   : > { %373 = vst [vmem:[#allocation2 + $0x10] sm:$0xcc] %v371_v59 }
  0xa6   : > { %v407_v63 = vrot.slane %v621_v62, 6  ;;  %v377_v0 = vpop.permute.xlu1 %376  ;;  %v375_v1 = vpop.permute.xlu0 %374  ;;  %v690_v2 = vld [vmem:[#allocation2 + $0x4] ss:$8 sps:$4 sm:$0xff]   ;;  %v692_v3 = vld [vmem:[#allocation2] ss:$8 sps:$4 sm:$0xff]  }
  0xa7   : > { %v383_v4 = vsel %vm378_vm0, %v377_v0, 0  ;;  %v379_v5 = vsel %vm378_vm0, %v375_v1, %v377_v0  ;;  %472 = vmatprep.subr.bf16.mxu0 %v690_v2 }
  0xa8   : > { %409 = vst [vmem:[#allocation2 + $0x18] sm:$0xcc] %v407_v63  ;;  %v386_v6 = vsel %vm265_vm10, %v383_v4, 0  ;;  %v385_v7 = vsel %vm264_vm9, %v379_v5, 0  ;;  %473 = vmatpush1.bf16.msra.mxu0 %v692_v3 }
  0xa9   : > { %v620_v8 = vcombine.low %v385_v7, %v386_v6 }
  0xaa   : > { %v413_v9 = vpop.permute.xlu1 %412  ;;  %v411_v10 = vpop.permute.xlu0 %410 }
  0xab   : > { %393 = vst [vmem:[#allocation2 + $0x18] sm:$0x33] %v620_v8  ;;  %v419_v11 = vsel %vm414_vm1, %v413_v9, 0  ;;  %v415_v12 = vsel %vm414_vm1, %v411_v10, %v413_v9 }
  0xac   : > { %v422_v13 = vsel %vm317_vm13, %v419_v11, 0  ;;  %v421_v14 = vsel %vm316_vm12, %v415_v12, 0 }
  0xad   : > { %v622_v15 = vcombine.low %v421_v14, %v422_v13 }
  0xaf   : > { %429 = vst [vmem:[#allocation2 + $0x20] sm:$0x33] %v622_v15 }
  0xb2   : > { %v693_v16 = vld [vmem:[#allocation2 + $0x14] ss:$8 sps:$4 sm:$0xff]   ;;  %v695_v17 = vld [vmem:[#allocation2 + $0x10] ss:$8 sps:$4 sm:$0xff]  }
  0xb3   : > { %474 = vmatprep.subr.bf16.mxu0 %v693_v16 }
  0xb4   : > { %475 = vmatpush1.bf16.msra.mxu0 %v695_v17 }
  0xb6   : > { %v435_v18 = vld [vmem:[#allocation2 + $0x20] sm:$0x33] }
  0xb7   : > { %v628_v19 = vcombine.high %v435_v18, %v435_v18  ;;  %v627_v20 = vcombine.low %v435_v18, %v435_v18 }
  0xb9   : > { %629 = vmatprep.subr.msk.bf16.mxu0 %vm465_vm2, %v628_v19  ;;  %v467_v21 = vsel %vm465_vm2, %v627_v20, 0 }
  0xba   : > { %477 = vmatpush1.bf16.msra.mxu0 %v467_v21 }
  0xbb   : > { %v517_v23 = vpop.permute.xlu0 %516  ;;  %v525_v25 = vpop.permute.xlu1 %524 }
  0xbd   : > { %630 = vmatmul.mubr.msk.bf16.vlgmr.msra.gmra.mrb[0].mxu0 %vm461_vm3, %v430_v22 }
 0x190   : > { %v506_v24 = vpop.f32.mrb[0].mxu0 }
 0x191   : > { %v519_v26 = vmul.f32 %v517_v23, %v506_v24  ;;  %v508_v27 = vpop.f32.mrb[1].mxu0 }
 0x192   : > { %v520_v28 = vmul.f32 %v517_v23, %v508_v27  ;;  %v510_v29 = vpop.f32.mrb[2].mxu0 }
 0x193   : > { %v527_v30 = vadd.f32 %v525_v25, %v519_v26  ;;  %v511_v31 = vpop.f32.mrb[3].mxu0 }
 0x194   : > { %v528_v32 = vadd.f32 %v525_v25, %v520_v28 }
 0x195   : > { %v529_v33 = vmax.f32 %v527_v30, 0.0 }
 0x196   : > { %v530_v34 = vmax.f32 %v528_v32, 0.0 }
 0x197   : > { %531 = vst [vmem:[%s190_s6] sm:$0xff] %v529_v33 }
 0x198   : > { %532 = vst [vmem:[%s190_s6 + $0x8] sm:$0xff] %v530_v34 }
 0x199   : > { %711 = shalt.err (!%p708_p3)
}
 0x19a   : > { %s712_s20 = scalar_lea.hbm %s902_s10, 256  ;;  %s716_s27 = scalar_lea.hbm %s948_s4, 512 }
 0x19b   : > { %p713_p4 = scmp.ne.s32.totalorder %s902_s10, %s712_s20  ;;  %p717_p9 = scmp.lt.u32.totalorder %s902_s10, %s948_s4 }
 0x19c   : > { %p718_p10 = scmp.lt.u32.totalorder %s716_s27, %s712_s20  ;;  %p720_p12 = scmp.lt.u32.totalorder %s712_s20, %s902_s10 }
 0x19d   : > { %p714_p7 = pnand %p713_p4, %p835_p5 }
 0x19e   : > { %p719_p11 = por %p718_p10, %p717_p9 }
 0x19f   : > { %p715_p8 = pneg %p714_p7 }
 0x1a0   : > { %p721_p13 = por %p720_p12, %p719_p11 }
 0x1a2   : > { %p722_p0 = pnand %p721_p13, %p715_p8 }
 0x1a4   : > { %725 = shalt.err (!%p722_p0)
}
 0x1a5   : > { %639 = dma.vmem_to_hbm [thread:$0]  (%p835_p5), %s904_s7, 256, %s902_s10, %s534_s11  }
 0x1a6 PF: > { %p645_p1 = scmp.ge.s32.totalorder %s760_s18, 2  ;;  %s560_s30 = sand.u32 1, %s748_s15  }
 0x1a7   : > { %s561_s5 = scalar_lea.sflag [#allocation4], %s560_s30 }
 0x1a8   : > { %p642_p2 = pnand %p645_p1, %p839_p6 }
 0x1aa   : > { %743 = dma.done.wait (!%p642_p2), %s561_s5, 256  }
 0x1ab   : > { %745 = vsyncadd (!%p642_p2), %s561_s5, 4294967040  ;;  %p14_p3 = scmp.ge.s32.totalorder %s822_s21, 4   ;;  %s951_s15 = smov %s752_s16 }
 0x1ac   : > { %s952_s16 = smov %s756_s17  ;;  %s953_s17 = smov %s833_s24 }
 0x1ad   : > { %s954_s18 = smov %s822_s21  ;;  %16 = sbr.rel (!%p14_p3) target bundleno = 3 (0x3), region = 71 }
 0x1b4   :  { %566 = vsyncpa [#allocation4], 1 }
 0x1b5   :  { %568 = vsyncpa [#allocation4 + $0x1], 1 }

</bundles_post_ra>
